<compile_context>
chip_gen: v6e
topology: v6e:2x2x1
jax: 0.10.0
libtpu: 0.0.40
codegen_flags: <defaults>
</compile_context>

<pallas_src>
import jax
import jax.numpy as jnp
from jax.experimental import pallas as pl
from jax.experimental.pallas import tpu as pltpu

HIDDEN = 768          # BERT pooler output dim
MID = 128             # self.lin output dim
NUM_CLASSES = 2       # sst2 / imdb -> 2 classes
C_PAD = 128           # lane-dense padded class dim (in-kernel compute only)


def _cdiv(a, b):
    return -(-a // b)


def _round_up(x, m):
    return ((x + m - 1) // m) * m


def _choose_tiling(B, block_b):
    """Pick (rows-per-tile, grid-size) for the batch axis."""
    if B <= 16:
        # Single full-array block: TB == B is always a legal block dim.
        return B, 1
    n = max(1, _cdiv(B, block_b))
    if n == 1:
        # Keep >=2 grid steps so v7x's two TensorCores both get work.
        n = 2
    tb = _round_up(_cdiv(B, n), 16)   # multiple of 16 for bf16 sublane packing
    return tb, _cdiv(B, tb)


def head_kernel(x_ref, w1_ref, b1_ref, w2_ref, b2_ref, o_ref):
    # lin: [TB, 768]f32 -> bf16 cast in-kernel (free under DMA) -> MXU, f32 acc
    x = x_ref[...].astype(jnp.bfloat16)
    h = jnp.dot(x, w1_ref[...], preferred_element_type=jnp.float32)
    # bias + ReLU in f32 (config.gs == False path)
    h = jnp.maximum(h + b1_ref[...], 0.0)
    # clf: [TB, 128]bf16 @ [128, 128(padded)]bf16 -> f32 acc, + padded bias
    # (padded bias columns are -1e30 so padded classes vanish under softmax)
    logits = jnp.dot(h.astype(jnp.bfloat16), w2_ref[...],
                     preferred_element_type=jnp.float32)
    logits = logits + b2_ref[...]
    # numerically stable softmax over the lane-dense padded axis
    m = jnp.max(logits, axis=-1, keepdims=True)
    e = jnp.exp(logits - m)
    denom = jnp.sum(e, axis=-1, keepdims=True)
    probs = e / denom                                  # exact normalization
    # write only the real classes (last block dim == full out-array dim)
    o_ref[...] = probs[:, : o_ref.shape[-1]].astype(o_ref.dtype)


def trainable_wrapper_head(x, w1, b1, w2, b2, *, block_b=1024):
    """x: [B, 768] f32 pooler features -> [B, num_classes] softmax probs."""
    B, H = x.shape
    assert H == HIDDEN
    C = w2.shape[1]

    # Class dim padded to 128 for lane-dense in-kernel compute only; the output
    # itself is written unpadded. Padded b2 columns at -1e30 -> exp == 0.
    w2p = jnp.zeros((MID, C_PAD), jnp.float32).at[:, :C].set(w2).astype(jnp.bfloat16)
    b2p = jnp.full((1, C_PAD), -1e30, jnp.float32).at[:, :C].set(b2)
    w1b = w1.astype(jnp.bfloat16)
    b1f = b1.astype(jnp.float32).reshape(1, MID)

    TB, grid_b = _choose_tiling(B, block_b)

    cost = pl.CostEstimate(
        flops=2 * B * HIDDEN * MID + 2 * B * MID * C_PAD,
        transcendentals=B * C_PAD,
        bytes_accessed=(B * HIDDEN * 4            # x stream (f32, cast in-kernel)
                        + HIDDEN * MID * 2        # w1 bf16
                        + MID * C_PAD * 2         # w2 bf16 (padded)
                        + (MID + C_PAD) * 4       # biases
                        + B * C * 4),             # unpadded output
    )

    out = pl.pallas_call(
        head_kernel,
        out_shape=jax.ShapeDtypeStruct((B, C), jnp.float32),
        grid=(grid_b,),
        in_specs=[
            pl.BlockSpec((TB, HIDDEN), lambda i: (i, 0)),    # x tile streams
            pl.BlockSpec((HIDDEN, MID), lambda i: (0, 0)),   # w1 resident
            pl.BlockSpec((1, MID), lambda i: (0, 0)),        # b1 resident
            pl.BlockSpec((MID, C_PAD), lambda i: (0, 0)),    # w2 (padded) resident
            pl.BlockSpec((1, C_PAD), lambda i: (0, 0)),      # b2 (padded) resident
        ],
        out_specs=pl.BlockSpec((TB, C), lambda i: (i, 0)),   # unpadded output
        compiler_params=pltpu.CompilerParams(
            dimension_semantics=("parallel",),
        ),
        cost_estimate=cost,
    )(x, w1b, b1f, w2p, b2p)

    return out


def init_params(key):
    """Deterministic PyTorch-style Linear init: U(-1/sqrt(fan_in), 1/sqrt(fan_in))."""
    k1, k2, k3, k4 = jax.random.split(key, 4)
    lim1 = 1.0 / jnp.sqrt(jnp.float32(HIDDEN))
    lim2 = 1.0 / jnp.sqrt(jnp.float32(MID))
    w1 = jax.random.uniform(k1, (HIDDEN, MID), jnp.float32, -lim1, lim1)
    b1 = jax.random.uniform(k2, (1, MID), jnp.float32, -lim1, lim1)
    w2 = jax.random.uniform(k3, (MID, NUM_CLASSES), jnp.float32, -lim2, lim2)
    b2 = jax.random.uniform(k4, (1, NUM_CLASSES), jnp.float32, -lim2, lim2)
    return w1, b1, w2, b2


def reference_bf16(x, w1, b1, w2, b2):
    """Mirrors the kernel's bf16-matmul / f32-accumulate path."""
    h = jnp.dot(x.astype(jnp.bfloat16), w1.astype(jnp.bfloat16),
                preferred_element_type=jnp.float32) + b1
    h = jnp.maximum(h, 0.0)
    logits = jnp.dot(h.astype(jnp.bfloat16), w2.astype(jnp.bfloat16),
                     preferred_element_type=jnp.float32) + b2
    return jax.nn.softmax(logits, axis=-1)


if __name__ == "__main__":
    key = jax.random.PRNGKey(0)
    k_x, k_p = jax.random.split(key)
    w1, b1, w2, b2 = init_params(k_p)

    # Synthetic BERT pooler_output features (stand-in for the pretrained encoder).
    #   8  -> single full-array block
    #   9  -> single full-array block, non-multiple-of-8 rows
    #   40 -> 2 grid steps with a masked partial last block
    for batch in (8, 9, 40):
        x = jax.random.normal(jax.random.fold_in(k_x, batch), (batch, HIDDEN),
                              dtype=jnp.float32)
        out = trainable_wrapper_head(x, w1, b1, w2, b2)
        out = jax.block_until_ready(out)

        ref = reference_bf16(x, w1, b1, w2, b2)
        assert out.shape == (batch, NUM_CLASSES)
        assert jnp.allclose(out, ref, atol=5e-3, rtol=5e-3)
        assert jnp.allclose(jnp.sum(out, axis=-1), 1.0, atol=5e-3)

    print("KERNEL_OK")
</pallas_src>

<mosaic_0001>
module attributes {stable_mosaic.version = 11 : i64} {
  func.func @head_kernel(%arg0: i32, %arg1: memref<8x768xf32, #tpu.memory_space<vmem>>, %arg2: memref<768x128xbf16, #tpu.memory_space<vmem>>, %arg3: memref<1x128xf32, #tpu.memory_space<vmem>>, %arg4: memref<128x128xbf16, #tpu.memory_space<vmem>>, %arg5: memref<1x128xf32, #tpu.memory_space<vmem>>, %arg6: memref<8x2xf32, #tpu.memory_space<vmem>>) attributes {dimension_semantics = [#tpu.dimension_semantics<parallel>], iteration_bounds = array<i64: 1>, scalar_prefetch = 0 : i64, scratch_operands = 0 : i64, tpu.core_type = #tpu.core_type<tc>, window_params = [{transform_indices = @transform_0, window_bounds = array<i64: 8, 768>}, {pipeline_mode = #tpu.pipeline_mode<synchronous>, transform_indices = @transform_1, window_bounds = array<i64: 768, 128>}, {pipeline_mode = #tpu.pipeline_mode<synchronous>, transform_indices = @transform_2, window_bounds = array<i64: 1, 128>}, {pipeline_mode = #tpu.pipeline_mode<synchronous>, transform_indices = @transform_3, window_bounds = array<i64: 128, 128>}, {pipeline_mode = #tpu.pipeline_mode<synchronous>, transform_indices = @transform_4, window_bounds = array<i64: 1, 128>}, {transform_indices = @transform_5, window_bounds = array<i64: 8, 2>}]} {
    %c0 = arith.constant 0 : index
    %c0_0 = arith.constant 0 : index
    %0 = vector.load %arg1[%c0, %c0_0] : memref<8x768xf32, #tpu.memory_space<vmem>>, vector<8x768xf32>
    %1 = arith.truncf %0 : vector<8x768xf32> to vector<8x768xbf16>
    %c0_1 = arith.constant 0 : index
    %c0_2 = arith.constant 0 : index
    %2 = vector.load %arg2[%c0_1, %c0_2] : memref<768x128xbf16, #tpu.memory_space<vmem>>, vector<768x128xbf16>
    %cst = arith.constant dense<0.000000e+00> : vector<8x128xf32>
    %3 = tpu.matmul %1, %2, %cst {dimension_numbers = #tpu.dot_dimension_numbers<[1], [0], [0], [1], [0, 0, 1, 1], [], []>} : vector<8x768xbf16>, vector<768x128xbf16>, vector<8x128xf32> -> vector<8x128xf32>
    %c0_3 = arith.constant 0 : index
    %c0_4 = arith.constant 0 : index
    %4 = vector.load %arg3[%c0_3, %c0_4] : memref<1x128xf32, #tpu.memory_space<vmem>>, vector<1x128xf32>
    %5 = vector.broadcast %4 : vector<1x128xf32> to vector<8x128xf32>
    %6 = arith.addf %3, %5 : vector<8x128xf32>
    %cst_5 = arith.constant 0.000000e+00 : f32
    %7 = vector.broadcast %cst_5 : f32 to vector<8x128xf32>
    %8 = arith.maximumf %6, %7 : vector<8x128xf32>
    %9 = arith.truncf %8 : vector<8x128xf32> to vector<8x128xbf16>
    %c0_6 = arith.constant 0 : index
    %c0_7 = arith.constant 0 : index
    %10 = vector.load %arg4[%c0_6, %c0_7] : memref<128x128xbf16, #tpu.memory_space<vmem>>, vector<128x128xbf16>
    %cst_8 = arith.constant dense<0.000000e+00> : vector<8x128xf32>
    %11 = tpu.matmul %9, %10, %cst_8 {dimension_numbers = #tpu.dot_dimension_numbers<[1], [0], [0], [1], [0, 0, 1, 1], [], []>} : vector<8x128xbf16>, vector<128x128xbf16>, vector<8x128xf32> -> vector<8x128xf32>
    %c0_9 = arith.constant 0 : index
    %c0_10 = arith.constant 0 : index
    %12 = vector.load %arg5[%c0_9, %c0_10] : memref<1x128xf32, #tpu.memory_space<vmem>>, vector<1x128xf32>
    %13 = vector.broadcast %12 : vector<1x128xf32> to vector<8x128xf32>
    %14 = arith.addf %11, %13 : vector<8x128xf32>
    %cst_11 = arith.constant dense<0xFF800000> : vector<8xf32>
    %15 = vector.multi_reduction <maximumf>, %14, %cst_11 [1] : vector<8x128xf32> to vector<8xf32>
    %16 = vector.shape_cast %15 : vector<8xf32> to vector<8x1xf32>
    %17 = vector.broadcast %16 : vector<8x1xf32> to vector<8x128xf32>
    %18 = arith.subf %14, %17 : vector<8x128xf32>
    %19 = math.exp %18 : vector<8x128xf32>
    %cst_12 = arith.constant dense<0.000000e+00> : vector<8xf32>
    %20 = vector.multi_reduction <add>, %19, %cst_12 [1] : vector<8x128xf32> to vector<8xf32>
    %21 = vector.shape_cast %20 : vector<8xf32> to vector<8x1xf32>
    %22 = vector.broadcast %21 : vector<8x1xf32> to vector<8x128xf32>
    %23 = arith.divf %19, %22 : vector<8x128xf32>
    %24 = vector.extract_strided_slice %23 {offsets = [0, 0], sizes = [8, 2], strides = [1, 1]} : vector<8x128xf32> to vector<8x2xf32>
    %c0_13 = arith.constant 0 : index
    %c0_14 = arith.constant 0 : index
    %25 = vector.load %arg6[%c0_13, %c0_14] : memref<8x2xf32, #tpu.memory_space<vmem>>, vector<8x2xf32>
    tpu.vector_store %arg6[%c0_13, %c0_14], %24 {strides = array<i32>} : memref<8x2xf32, #tpu.memory_space<vmem>>, vector<8x2xf32>,
    return
  }
  func.func @transform_0(%arg0: i32) -> (i32, i32) {
    %c0_i32 = arith.constant 0 : i32
    %c0_i32_0 = arith.constant 0 : i32
    return %arg0, %c0_i32 : i32, i32
  }
  func.func @transform_1(%arg0: i32) -> (i32, i32) {
    %c0_i32 = arith.constant 0 : i32
    %c0_i32_0 = arith.constant 0 : i32
    %c0_i32_1 = arith.constant 0 : i32
    return %c0_i32, %c0_i32_0 : i32, i32
  }
  func.func @transform_2(%arg0: i32) -> (i32, i32) {
    %c0_i32 = arith.constant 0 : i32
    %c0_i32_0 = arith.constant 0 : i32
    %c0_i32_1 = arith.constant 0 : i32
    return %c0_i32, %c0_i32_0 : i32, i32
  }
  func.func @transform_3(%arg0: i32) -> (i32, i32) {
    %c0_i32 = arith.constant 0 : i32
    %c0_i32_0 = arith.constant 0 : i32
    %c0_i32_1 = arith.constant 0 : i32
    return %c0_i32, %c0_i32_0 : i32, i32
  }
  func.func @transform_4(%arg0: i32) -> (i32, i32) {
    %c0_i32 = arith.constant 0 : i32
    %c0_i32_0 = arith.constant 0 : i32
    %c0_i32_1 = arith.constant 0 : i32
    return %c0_i32, %c0_i32_0 : i32, i32
  }
  func.func @transform_5(%arg0: i32) -> (i32, i32) {
    %c0_i32 = arith.constant 0 : i32
    %c0_i32_0 = arith.constant 0 : i32
    return %arg0, %c0_i32 : i32, i32
  }
}

</mosaic_0001>

<bundles_post_ra>
// kernel: tpu_custom_call.1
= control target key start
LH: loop header
LB: loop body
LE: loop exit
PB: predicated region body
PF: predicated region fallthrough
CT: control target
= control target key end

     0   :  { %10 = vsyncpa [#allocation3], 0  ;;  %s1052_s0 = inlined_call_operand.hbm [shape: f32[8,768], index: 0, kind: input, shape index: {}]   ;;  %s1053_s1 = inlined_call_operand.hbm [shape: bf16[768,128], index: 1, kind: input, shape index: {}]   ;;  %s1054_s2 = inlined_call_operand.vmem [shape: f32[1,128], index: 2, kind: input, shape index: {}]   ;;  %s1055_s3 = inlined_call_operand.hbm [shape: bf16[128,128], index: 3, kind: input, shape index: {}]   ;;  %s1056_s4 = inlined_call_operand.vmem [shape: f32[1,128], index: 4, kind: input, shape index: {}]   ;;  %s1057_s5 = inlined_call_operand.vmem [shape: f32[8,2], index: 5, kind: output, shape index: {}]  }
   0x1   :  { %11 = vsyncpa [#allocation5], 0  ;;  %s997_s18 = smov [#allocation4]  }
   0x2   :  { %s27_s19 = sshll.u32 %s997_s18, 4  ;;  %s28_s19 = int_to_ptr.vmem [resolvable:$true] %s27_s19 }
   0x3   :  { %s941_s20 = scalar_lea.vmem %s28_s19, 6144  ;;  %p946_p1 = scmp.lt.s32.totalorder %s28_s19, %s28_s19 }
   0x4   :  { %p942_p0 = scmp.ne.s32.totalorder %s28_s19, %s941_s20  ;;  %p947_p2 = scmp.lt.s32.totalorder %s941_s20, %s941_s20 }
   0x6   :  { %p948_p3 = por %p947_p2, %p946_p1 }
   0x8   :  { %p949_p4 = pnand %p948_p3, %p942_p0 }
   0xa   :  { %952 = shalt.err (!%p949_p4)
}
   0xb   :  { %s998_s21 = smov 64   ;;  %s999_s22 = smov 4  }
   0xc   :  { %33 = dma.hbm_to_vmem [thread:$0]  %s1053_s1, 6144, %s28_s19, [#allocation5], %s998_s21, %s998_s21, %s999_s22  }
   0xd   :  { %s1000_s25 = smov [#allocation2]   ;;  %s1001_s27 = smov [#allocation6]  }
   0xe   :  { %s18_s26 = sshll.u32 %s1000_s25, 4  ;;  %s41_s28 = sshll.u32 %s1001_s27, 4  ;;  %s19_s26 = int_to_ptr.vmem [resolvable:$true] %s18_s26  ;;  %s42_s28 = int_to_ptr.vmem [resolvable:$true] %s41_s28 }
   0xf   :  { %s961_s29 = scalar_lea.vmem %s19_s26, 768  ;;  %p966_p6 = scmp.lt.s32.totalorder %s19_s26, %s19_s26 }
  0x10   :  { %p962_p5 = scmp.ne.s32.totalorder %s19_s26, %s961_s29  ;;  %p967_p7 = scmp.lt.s32.totalorder %s961_s29, %s961_s29 }
  0x12   :  { %p968_p8 = por %p967_p7, %p966_p6 }
  0x14   :  { %p969_p9 = pnand %p968_p8, %p962_p5 }
  0x16   :  { %972 = shalt.err (!%p969_p9)
}
  0x17   :  { %21 = dma.hbm_to_vmem [thread:$0]  %s1052_s0, 768, %s19_s26, [#allocation3]  }
  0x18   :  { %s981_s7 = scalar_lea.vmem %s42_s28, 1024  ;;  %p986_p11 = scmp.lt.s32.totalorder %s42_s28, %s42_s28 }
  0x19   :  { %p982_p10 = scmp.ne.s32.totalorder %s42_s28, %s981_s7  ;;  %p987_p12 = scmp.lt.s32.totalorder %s981_s7, %s981_s7 }
  0x1b   :  { %p988_p13 = por %p987_p12, %p986_p11 }
  0x1d   :  { %p989_p0 = pnand %p988_p13, %p982_p10 }
  0x1f   :  { %992 = shalt.err (!%p989_p0)
}
  0x20   :  { %47 = dma.hbm_to_vmem [thread:$0]  %s1055_s3, 1024, %s42_s28, [#allocation5], %s998_s21, %s998_s21, %s999_s22  }
  0x21   :  { %993 = dma.done.wait [#allocation3], 768  }
  0x22   :  { %994 = vsyncadd [#allocation3], 4294966528 }
  0x23   :  { %995 = dma.done.wait [#allocation5], 7168  }
  0x24   :  { %996 = vsyncadd [#allocation5], 4294960128  ;;  %v873_v0 = vld [vmem:[#allocation4 + $0x78] sm:$0xff]   ;;  %v877_v4 = vld [vmem:[#allocation4 + $0x70] sm:$0xff]   ;;  %v1002_v61 = vmov 0.0   ;;  %vm1003_vm0 = vmmov 0  }
  0x25   :  { %v874_v1 = vld [vmem:[#allocation4 + $0x38] sm:$0xff]   ;;  %771 = vmatprep.subr.bf16.mxu0 %v873_v0  ;;  %v878_v5 = vld [vmem:[#allocation4 + $0x30] sm:$0xff]   ;;  %v881_v8 = vld [vmem:[#allocation4 + $0x68] sm:$0xff]   ;;  %vm705_vm1 = vcmask 15360  }
  0x26   :  { %v875_v2 = vld [vmem:[#allocation4 + $0xf8] sm:$0xff]   ;;  %772 = vmatpush3.bf16.msra.mxu0 %v874_v1  ;;  %v879_v6 = vld [vmem:[#allocation4 + $0xf0] sm:$0xff]   ;;  %v882_v9 = vld [vmem:[#allocation4 + $0x28] sm:$0xff]  }
  0x27   :  { %v876_v3 = vld [vmem:[#allocation4 + $0xb8] sm:$0xff]   ;;  %793 = vmatprep.subr.bf16.mxu1 %v875_v2  ;;  %773 = vmatprep.subr.bf16.mxu0 %v877_v4  ;;  %v880_v7 = vld [vmem:[#allocation4 + $0xb0] sm:$0xff]   ;;  %v883_v10 = vld [vmem:[#allocation4 + $0xe8] sm:$0xff]  }
  0x28   :  { %794 = vmatpush3.bf16.msra.mxu1 %v876_v3  ;;  %v884_v11 = vld [vmem:[#allocation4 + $0xa8] sm:$0xff]   ;;  %v885_v12 = vld [vmem:[#allocation4 + $0x60] sm:$0xff]   ;;  %v889_v16 = vld [vmem:[#allocation4 + $0x58] sm:$0xff]  }
  0x29   :  { %795 = vmatprep.subr.bf16.mxu1 %v879_v6  ;;  %v886_v13 = vld [vmem:[#allocation4 + $0x20] sm:$0xff]   ;;  %v890_v17 = vld [vmem:[#allocation4 + $0x18] sm:$0xff]   ;;  %v893_v20 = vld [vmem:[#allocation4 + $0x50] sm:$0xff]  }
  0x2a   :  { %774 = vmatpush3.bf16.msra.mxu0 %v878_v5  ;;  %v887_v14 = vld [vmem:[#allocation4 + $0xe0] sm:$0xff]   ;;  %v891_v18 = vld [vmem:[#allocation4 + $0xd8] sm:$0xff]   ;;  %v894_v21 = vld [vmem:[#allocation4 + $0x10] sm:$0xff]  }
  0x2b   :  { %775 = vmatprep.subr.bf16.mxu0 %v881_v8  ;;  %v888_v15 = vld [vmem:[#allocation4 + $0xa0] sm:$0xff]   ;;  %v892_v19 = vld [vmem:[#allocation4 + $0x98] sm:$0xff]   ;;  %v895_v22 = vld [vmem:[#allocation4 + $0xd0] sm:$0xff]  }
  0x2c   :  { %796 = vmatpush3.bf16.msra.mxu1 %v880_v7  ;;  %v896_v23 = vld [vmem:[#allocation4 + $0x90] sm:$0xff]   ;;  %v897_v24 = vld [vmem:[#allocation4 + $0x48] sm:$0xff]   ;;  %v901_v28 = vld [vmem:[#allocation4 + $0x40] sm:$0xff]  }
  0x2d   :  { %797 = vmatprep.subr.bf16.mxu1 %v883_v10  ;;  %v898_v25 = vld [vmem:[#allocation4 + $0x8] sm:$0xff]   ;;  %v902_v29 = vld [vmem:[#allocation4] sm:$0xff]   ;;  %v61_v31 = vld [vmem:[#allocation2 + $0x8] sm:$0xff] }
  0x2e   :  { %776 = vmatpush3.bf16.msra.mxu0 %v882_v9  ;;  %v899_v26 = vld [vmem:[#allocation4 + $0xc8] sm:$0xff]   ;;  %v903_v30 = vld [vmem:[#allocation4 + $0xc0] sm:$0xff]   ;;  %v67_v32 = vpack.c.bf16 %v61_v31, %v61_v31  ;;  %v60_v34 = vld [vmem:[#allocation2] sm:$0xff] }
  0x2f   :  { %777 = vmatprep.subr.bf16.mxu0 %v885_v12  ;;  %v900_v27 = vld [vmem:[#allocation4 + $0x88] sm:$0xff]   ;;  %v904_v33 = vld [vmem:[#allocation4 + $0x80] sm:$0xff]   ;;  %v66_v35 = vpack.c.bf16 %v60_v34, %v60_v34  ;;  %v905_v36 = vld [vmem:[#allocation4 + $0x178] sm:$0xff]  }
  0x30   :  { %798 = vmatpush3.bf16.msra.mxu1 %v884_v11  ;;  %v63_v37 = vld [vmem:[#allocation2 + $0x18] sm:$0xff]  ;;  %495 = vmatprep.mubr.bf16.mxu0 %v67_v32  ;;  %v906_v39 = vld [vmem:[#allocation4 + $0x138] sm:$0xff]   ;;  %v62_v40 = vld [vmem:[#allocation2 + $0x10] sm:$0xff] }
  0x31   :  { %799 = vmatprep.subr.bf16.mxu1 %v887_v14  ;;  %v69_v38 = vpack.c.bf16 %v63_v37, %v63_v37  ;;  %v68_v41 = vpack.c.bf16 %v62_v40, %v62_v40  ;;  %v907_v42 = vld [vmem:[#allocation4 + $0x170] sm:$0xff]   ;;  %v909_v44 = vld [vmem:[#allocation4 + $0x168] sm:$0xff]   ;;  %v911_v46 = vld [vmem:[#allocation4 + $0x160] sm:$0xff]  }
  0x32   :  { %778 = vmatpush3.bf16.msra.mxu0 %v886_v13  ;;  %v908_v43 = vld [vmem:[#allocation4 + $0x130] sm:$0xff]   ;;  %v910_v45 = vld [vmem:[#allocation4 + $0x128] sm:$0xff]   ;;  %v912_v47 = vld [vmem:[#allocation4 + $0x120] sm:$0xff]  }
  0x33   :  { %779 = vmatprep.subr.bf16.mxu0 %v889_v16  ;;  %535 = vmatprep.mubr.bf16.mxu1 %v69_v38  ;;  %v913_v48 = vld [vmem:[#allocation4 + $0x158] sm:$0xff]   ;;  %v915_v50 = vld [vmem:[#allocation4 + $0x150] sm:$0xff]   ;;  %v917_v54 = vld [vmem:[#allocation4 + $0x148] sm:$0xff]  }
  0x34   :  { %800 = vmatpush3.bf16.msra.mxu1 %v888_v15  ;;  %v914_v49 = vld [vmem:[#allocation4 + $0x118] sm:$0xff]   ;;  %v916_v52 = vld [vmem:[#allocation4 + $0x110] sm:$0xff]   ;;  %v918_v55 = vld [vmem:[#allocation4 + $0x108] sm:$0xff]  }
  0x35   :  { %801 = vmatprep.subr.bf16.mxu1 %v891_v18  ;;  %v65_v51 = vld [vmem:[#allocation2 + $0x28] sm:$0xff]  ;;  %v919_v56 = vld [vmem:[#allocation4 + $0x140] sm:$0xff]   ;;  %v64_v58 = vld [vmem:[#allocation2 + $0x20] sm:$0xff] }
  0x36   :  { %780 = vmatpush3.bf16.msra.mxu0 %v890_v17  ;;  %v71_v53 = vpack.c.bf16 %v65_v51, %v65_v51  ;;  %v920_v57 = vld [vmem:[#allocation4 + $0x100] sm:$0xff]   ;;  %v70_v59 = vpack.c.bf16 %v64_v58, %v64_v58  ;;  %v921_v60 = vld [vmem:[#allocation6 + $0x38] sm:$0xff]   ;;  %v922_v62 = vld [vmem:[#allocation6 + $0x30] sm:$0xff]  }
  0x37   :  { %781 = vmatprep.subr.bf16.mxu0 %v893_v20  ;;  %v923_v63 = vld [vmem:[#allocation6 + $0x28] sm:$0xff]   ;;  %v924_v0 = vld [vmem:[#allocation6 + $0x20] sm:$0xff]   ;;  %v925_v1 = vld [vmem:[#allocation6 + $0x18] sm:$0xff]  }
  0x38   :  { %802 = vmatpush3.bf16.msra.mxu1 %v892_v19  ;;  %v926_v2 = vld [vmem:[#allocation6 + $0x10] sm:$0xff]   ;;  %v927_v3 = vld [vmem:[#allocation6 + $0x8] sm:$0xff]   ;;  %v928_v4 = vld [vmem:[#allocation6] sm:$0xff]  }
  0x39   :  { %803 = vmatprep.subr.bf16.mxu1 %v895_v22  ;;  %v713_v14 = vld [vmem:[%s1054_s2] ss:$0 sm:$0xff] }
  0x3a   :  { %782 = vmatpush3.bf16.msra.mxu0 %v894_v21 }
  0x3b   :  { %783 = vmatprep.subr.bf16.mxu0 %v897_v24 }
  0x3c   :  { %804 = vmatpush3.bf16.msra.mxu1 %v896_v23 }
  0x3d   :  { %805 = vmatprep.subr.bf16.mxu1 %v899_v26  ;;  %v762_v26 = vld [vmem:[%s1056_s4] ss:$0 sm:$0xff] }
  0x3e   :  { %784 = vmatpush3.bf16.msra.mxu0 %v898_v25 }
  0x3f   :  { %785 = vmatprep.subr.bf16.mxu0 %v901_v28 }
  0x40   :  { %806 = vmatpush3.bf16.msra.mxu1 %v900_v27 }
  0x41   :  { %807 = vmatprep.subr.bf16.mxu1 %v903_v30 }
  0x42   :  { %786 = vmatpush3.bf16.msra.mxu0 %v902_v29 }
  0x43   :  { %815 = vmatprep.subr.bf16.mxu0 %v905_v36 }
  0x44   :  { %808 = vmatpush3.bf16.msra.mxu1 %v904_v33 }
  0x45   :  { %496 = vmatmul.mubr.bf16.vlgmr.msra.gmra.mxu0 %v66_v35  ;;  %846 = vmatprep.subr.bf16.mxu1 %v1002_v61 }
  0x46   :  { %816 = vmatpush3.bf16.msra.mxu0 %v906_v39  ;;  %575 = vmatprep.mubr.bf16.mxu0 %v71_v53 }
  0x47   :  { %536 = vmatmul.mubr.bf16.vlgmr.msra.gmra.mxu1 %v68_v41  ;;  %817 = vmatprep.subr.bf16.mxu0 %v907_v42 }
  0x48   :  { %847 = vmatpush3.bf16.msra.mxu1 %v921_v60  ;;  %862 = vmatprep.mubr.msk.bf16.mxu1 %vm1003_vm0, %v1002_v61 }
  0x49   :  { %848 = vmatprep.subr.bf16.mxu1 %v1002_v61 }
  0x4a   :  { %818 = vmatpush3.bf16.msra.mxu0 %v908_v43 }
  0x4b   :  { %819 = vmatprep.subr.bf16.mxu0 %v909_v44 }
  0x4c   :  { %849 = vmatpush3.bf16.msra.mxu1 %v922_v62 }
  0x4d   :  { %850 = vmatprep.subr.bf16.mxu1 %v1002_v61 }
  0x4e   :  { %820 = vmatpush3.bf16.msra.mxu0 %v910_v45 }
  0x4f   :  { %821 = vmatprep.subr.bf16.mxu0 %v911_v46 }
  0x50   :  { %851 = vmatpush3.bf16.msra.mxu1 %v923_v63 }
  0x51   :  { %852 = vmatprep.subr.bf16.mxu1 %v1002_v61 }
  0x52   :  { %822 = vmatpush3.bf16.msra.mxu0 %v912_v47 }
  0x53   :  { %823 = vmatprep.subr.bf16.mxu0 %v913_v48 }
  0x54   :  { %853 = vmatpush3.bf16.msra.mxu1 %v924_v0 }
  0x55   :  { %854 = vmatprep.subr.bf16.mxu1 %v1002_v61 }
  0x56   :  { %824 = vmatpush3.bf16.msra.mxu0 %v914_v49 }
  0x57   :  { %825 = vmatprep.subr.bf16.mxu0 %v915_v50 }
  0x58   :  { %855 = vmatpush3.bf16.msra.mxu1 %v925_v1 }
  0x59   :  { %856 = vmatprep.subr.bf16.mxu1 %v1002_v61 }
  0x5a   :  { %826 = vmatpush3.bf16.msra.mxu0 %v916_v52 }
  0x5b   :  { %827 = vmatprep.subr.bf16.mxu0 %v917_v54 }
  0x5c   :  { %857 = vmatpush3.bf16.msra.mxu1 %v926_v2 }
  0x5d   :  { %858 = vmatprep.subr.bf16.mxu1 %v1002_v61 }
  0x5e   :  { %828 = vmatpush3.bf16.msra.mxu0 %v918_v55 }
  0x5f   :  { %829 = vmatprep.subr.bf16.mxu0 %v919_v56 }
  0x60   :  { %859 = vmatpush3.bf16.msra.mxu1 %v927_v3 }
  0x61   :  { %860 = vmatprep.subr.bf16.mxu1 %v1002_v61 }
  0x62   :  { %830 = vmatpush3.bf16.msra.mxu0 %v920_v57 }
  0x64   :  { %861 = vmatpush3.bf16.msra.mxu1 %v928_v4 }
  0x65   :  { %576 = vmatmul.mubr.bf16.vlgmr.msra.gmra.mxu0 %v70_v59 }
 0x105   :  { %v787_v5 = vpop.f32.mrf.mxu0 }
 0x107   :  { %v788_v6 = vpop.f32.mrf.mxu0  ;;  %v809_v7 = vpop.f32.mrf.mxu1 }
 0x108   :  { %v789_v13 = vadd.f32 %v788_v6, %v787_v5 }
 0x109   :  { %v790_v8 = vpop.f32.mrf.mxu0  ;;  %v810_v9 = vpop.f32.mrf.mxu1 }
 0x10a   :  { %v498_v15 = vadd.f32 %v789_v13, %v713_v14  ;;  %v811_v16 = vadd.f32 %v810_v9, %v809_v7 }
 0x10b   :  { %v791_v10 = vpop.f32.mrf.mxu0  ;;  %v812_v11 = vpop.f32.mrf.mxu1 }
 0x10c   :  { %v538_v19 = vadd.f32 %v811_v16, %v498_v15 }
 0x10d   :  { %v813_v12 = vpop.f32.mrf.mxu1 }
 0x125   :  { %v831_v17 = vpop.f32.mrf.mxu0 }
 0x127   :  { %v832_v18 = vpop.f32.mrf.mxu0 }
 0x128   :  { %v833_v20 = vadd.f32 %v832_v18, %v831_v17 }
 0x129   :  { %v834_v21 = vpop.f32.mrf.mxu0 }
 0x12a   :  { %v578_v22 = vadd.f32 %v833_v20, %v538_v19 }
 0x12b   :  { %v835_v23 = vpop.f32.mrf.mxu0 }
 0x12c   :  { %v583_v24 = vmax.f32 %v578_v22, 0.0 }
 0x12e   :  { %v584_v25 = vpack.c.bf16 %v583_v24, %v583_v24 }
 0x130   :  { %863 = vmatmul.mubr.bf16.vlgmr.msra.gmra.mxu1 %v584_v25 }
 0x1f0   :  { %v690_v27 = vpop.f32.mrf.mxu1 }
 0x1f1   :  { %v691_v28 = vadd.f32 %v762_v26, %v690_v27 }
 0x1f2   :  { %v864_v29 = vpop.f32.mrf.mxu1 }
 0x1f3   :  { %696 = vmax.xlane.f32.xlu0 %v691_v28 }
 0x1f4   :  { %v693_v30 = vpop.f32.mrf.mxu1 }
 0x1f6   :  { %v865_v31 = vpop.f32.mrf.mxu1 }
 0x27c   :  { %v697_v32 = vpop.xlane.xlu0 %696 }
 0x27d   :  { %v698_v33 = vsub.f32 %v691_v28, %v697_v32 }
 0x27f   :  { %v699_v34 = vmul.f32 1.442695, %v698_v33 }
 0x281   :  { %929 = vpow2.f32 %v699_v34 }
 0x28e   :  { %v930_v35 = vpop.eup %929 }
 0x28f   :  { %701 = vadd.xlane.f32.xlu0 %v930_v35 }
 0x318   :  { %v702_v36 = vpop.xlane.xlu0 %701 }
 0x319   :  { %931 = vrcp.f32 %v702_v36 }
 0x326   :  { %v932_v37 = vpop.eup %931 }
 0x327   :  { %v704_v38 = vmul.f32 %v932_v37, %v930_v35 }
 0x329   :  { %706 = vst.msk [vmem:[%s1057_s5] sm:$0xff] %vm705_vm1, %v704_v38 }
 0x32a   :  { %711 = vsyncpa [#allocation3], 1 }
 0x32b   :  { %712 = vsyncpa [#allocation5], 1 }

</bundles_post_ra>
